<compile_context>
chip_gen: v5e
topology: v5e:2x2
jax: 0.10.0
libtpu: 0.0.40
codegen_flags: <defaults>
</compile_context>

<pallas_src>
import functools

import jax
import jax.numpy as jnp
from jax.experimental import pallas as pl
from jax.experimental.pallas import tpu as pltpu


# ----------------------------------------------------------------------------
# Kernel 1: attention + fused single-step LSTM cell (everything small, VMEM).
# ----------------------------------------------------------------------------
def _attn_lstm_kernel(
    # inputs
    emb_ref,      # (B, H)    f32  embedded input token
    hid_ref,      # (B, H)    f32  previous hidden state
    cell_ref,     # (B, H)    f32  previous cell state
    enc_ref,      # (B, S, H) f32  encoder outputs
    w_ah_ref,     # (H, H)    bf16 attention weight acting on hidden
    w_ae_ref,     # (H, H)    bf16 attention weight acting on encoder
    b_a_ref,      # (1, 1, H) f32  attention bias
    v_ref,        # (1, 1, H) f32  attention scoring vector
    w_x_ref,      # (3H, 4H)  bf16 fused LSTM weight for [emb ; context ; hid]
    b_l_ref,      # (1, 4H)   f32  LSTM bias (b_ih + b_hh)
    # outputs
    h_out_ref,    # (B, H)    f32
    c_out_ref,    # (B, H)    f32
    attn_ref,     # (B, S)    f32
    hc_ref,       # (B, 2H)   bf16 [h_new ; context] for the vocab projection
):
    emb = emb_ref[...]
    hid = hid_ref[...]
    cell = cell_ref[...]
    enc = enc_ref[...]                                                # (B, S, H)
    H = hid.shape[-1]

    # ---------------- Bahdanau attention ----------------
    hid_proj = jnp.dot(hid.astype(jnp.bfloat16), w_ah_ref[...],
                       preferred_element_type=jnp.float32)            # (B, H)
    enc_proj = jax.lax.dot_general(
        enc.astype(jnp.bfloat16), w_ae_ref[...], (((2,), (0,)), ((), ())),
        preferred_element_type=jnp.float32)                           # (B, S, H)
    e = jnp.tanh(enc_proj + hid_proj[:, None, :] + b_a_ref[...])      # (B, S, H)
    scores = jnp.sum(e * v_ref[...], axis=-1)                         # (B, S)

    # softmax over the source-sequence axis (EUP reciprocal instead of divide)
    m = jnp.max(scores, axis=-1, keepdims=True)
    p = jnp.exp(scores - m)
    attn = p * pl.reciprocal(jnp.sum(p, axis=-1, keepdims=True), approx=True)
    attn_ref[...] = attn                                              # (B, S)

    # context = attn^T . encoder_outputs  -> batched MXU contraction
    ctx3 = jax.lax.dot_general(
        attn[:, None, :], enc, (((2,), (1,)), ((0,), (0,))),
        preferred_element_type=jnp.float32)                           # (B, 1, H)
    context = ctx3[:, 0, :]                                           # (B, H)

    # ---------------- fused LSTM cell (single MXU matmul) ----------------
    x_cat = jnp.concatenate([emb, context, hid], axis=-1)             # (B, 3H)
    gates = (jnp.dot(x_cat.astype(jnp.bfloat16), w_x_ref[...],
                     preferred_element_type=jnp.float32)
             + b_l_ref[...])                                          # (B, 4H)
    i_g = jax.nn.sigmoid(gates[:, 0 * H:1 * H])
    f_g = jax.nn.sigmoid(gates[:, 1 * H:2 * H])
    g_g = jnp.tanh(gates[:, 2 * H:3 * H])
    o_g = jax.nn.sigmoid(gates[:, 3 * H:4 * H])
    c_new = f_g * cell + i_g * g_g
    h_new = o_g * jnp.tanh(c_new)
    c_out_ref[...] = c_new
    h_out_ref[...] = h_new

    # features for the tiled vocab projection: [h_new ; context]
    hc_ref[...] = jnp.concatenate([h_new, context], axis=-1).astype(jnp.bfloat16)


# ----------------------------------------------------------------------------
# Kernel 2: vocab projection, tiled/streamed over the (padded) vocab dim.
# ----------------------------------------------------------------------------
def _vocab_proj_kernel(hc_ref, w_ref, b_ref, pred_ref):
    # hc: (B, 2H) bf16 (resident) ; w: (2H, TILE_V) bf16 (streamed) ;
    # b: (1, TILE_V) f32 ; pred: (B, TILE_V) f32 (lane-dense stores)
    pred_ref[...] = (
        jnp.dot(hc_ref[...], w_ref[...], preferred_element_type=jnp.float32)
        + b_ref[...])


# ----------------------------------------------------------------------------
# One-time parameter preparation (hoisted out of the decode step).
# ----------------------------------------------------------------------------
def _round_up(x, m):
    return ((x + m - 1) // m) * m


def _pick_tile_v(v_padded, h):
    # largest 128-multiple tile that divides the padded vocab and keeps the
    # double-buffered (2H, TILE_V) bf16 weight blocks under ~16 MiB (safe on
    # v7x's 64 MiB VMEM with the default 32 MiB scoped limit).
    for t in (1024, 512, 256, 128):
        if v_padded % t == 0 and 2 * (2 * h * t * 2) <= 16 * 1024 * 1024:
            return t
    return 128


def prepare_params(raw, *, hidden_size):
    """Torch-layout params -> fused, (in,out)-layout, bf16, vocab-padded."""
    H = hidden_size
    V = raw["fc_w"].shape[0]
    Vp = _round_up(V, 128)                      # lane-pad the vocab dim

    w_attn = raw["attn_w"]                      # (H, 2H)
    w_ih = raw["lstm_w_ih"]                     # (4H, 2H), input = [emb ; ctx]
    w_hh = raw["lstm_w_hh"]                     # (4H, H)
    w_fc = raw["fc_w"]                          # (V, 2H), input = [h ; ctx]

    # fused LSTM weight acting on [emb ; context ; hid]  -> (3H, 4H)
    w_x = jnp.concatenate([w_ih.T, w_hh.T], axis=0)
    # fused fc weight acting on [h_new ; context]        -> (2H, Vp)
    w_fc_t = jnp.pad(w_fc.T, ((0, 0), (0, Vp - V)))
    b_fc = jnp.pad(raw["fc_b"], (0, Vp - V)).reshape(1, Vp)

    return {
        "embedding": raw["embedding"],                                  # (V, H) f32
        "w_ah": w_attn[:, :H].T.astype(jnp.bfloat16),                   # (H, H)
        "w_ae": w_attn[:, H:].T.astype(jnp.bfloat16),                   # (H, H)
        "b_a": raw["attn_b"].reshape(1, 1, H).astype(jnp.float32),      # (1,1,H)
        "v": raw["v_w"].reshape(1, 1, H).astype(jnp.float32),           # (1,1,H)
        "w_x": w_x.astype(jnp.bfloat16),                                # (3H,4H)
        "b_l": (raw["lstm_b_ih"] + raw["lstm_b_hh"]).reshape(1, 4 * H), # (1,4H)
        "w_fc": w_fc_t.astype(jnp.bfloat16),                            # (2H,Vp)
        "b_fc": b_fc.astype(jnp.float32),                               # (1,Vp)
    }


# ----------------------------------------------------------------------------
# Per-step decoder forward (jit'd).
# ----------------------------------------------------------------------------
@functools.partial(jax.jit, static_argnames=("output_size",))
def decoder_forward(params, token_ids, hidden, cell, encoder_outputs, *,
                    output_size):
    B, H = hidden.shape
    S = encoder_outputs.shape[1]
    V = output_size
    Vp = params["w_fc"].shape[1]
    tile_v = _pick_tile_v(Vp, H)

    # glue: embedding lookup (gather) done outside the kernel
    embedded = jnp.take(params["embedding"], token_ids, axis=0)        # (B, H)

    vmem = pl.BlockSpec(memory_space=pltpu.MemorySpace.VMEM)
    state_out_shapes = (
        jax.ShapeDtypeStruct((B, H), jnp.float32),        # new hidden
        jax.ShapeDtypeStruct((B, H), jnp.float32),        # new cell
        jax.ShapeDtypeStruct((B, S), jnp.float32),        # attention weights
        jax.ShapeDtypeStruct((B, 2 * H), jnp.bfloat16),   # [h_new ; context]
    )
    h_new, c_new, attn, hc = pl.pallas_call(
        _attn_lstm_kernel,
        out_shape=state_out_shapes,
        in_specs=[vmem] * 10,
        out_specs=tuple([vmem] * 4),
        # recurrent state updated in place (caller should donate for full win)
        input_output_aliases={1: 0, 2: 1},
        compiler_params=pltpu.CompilerParams(
            vmem_limit_bytes=32 * 1024 * 1024),
    )(embedded, hidden, cell, encoder_outputs,
      params["w_ah"], params["w_ae"], params["b_a"], params["v"],
      params["w_x"], params["b_l"])

    # vocab projection: stream (2H, TILE_V) weight blocks, parallel over V.
    pred_padded = pl.pallas_call(
        _vocab_proj_kernel,
        out_shape=jax.ShapeDtypeStruct((B, Vp), jnp.float32),
        grid=(Vp // tile_v,),
        in_specs=[
            pl.BlockSpec((B, 2 * H), lambda j: (0, 0)),        # resident
            pl.BlockSpec((2 * H, tile_v), lambda j: (0, j)),   # streamed weights
            pl.BlockSpec((1, tile_v), lambda j: (0, j)),       # streamed bias
        ],
        out_specs=pl.BlockSpec((B, tile_v), lambda j: (0, j)),
        compiler_params=pltpu.CompilerParams(
            dimension_semantics=("parallel",),                 # 2 TCs on v7x
            vmem_limit_bytes=32 * 1024 * 1024),
    )(hc, params["w_fc"], params["b_fc"])

    pred = pred_padded[:, :V]
    return pred, h_new, c_new, attn


# ----------------------------------------------------------------------------
# Torch-layout parameter init (matches nn.Linear / nn.LSTM conventions).
# ----------------------------------------------------------------------------
def init_torch_params(key, output_size, hidden_size):
    H, V = hidden_size, output_size
    keys = jax.random.split(key, 10)
    s = 0.1
    return {
        "embedding": jax.random.normal(keys[0], (V, H), jnp.float32) * s,
        "attn_w":    jax.random.normal(keys[1], (H, 2 * H), jnp.float32) * s,
        "attn_b":    jax.random.normal(keys[2], (H,), jnp.float32) * s,
        "v_w":       jax.random.normal(keys[3], (H,), jnp.float32) * s,
        "lstm_w_ih": jax.random.normal(keys[4], (4 * H, 2 * H), jnp.float32) * s,
        "lstm_w_hh": jax.random.normal(keys[5], (4 * H, H), jnp.float32) * s,
        "lstm_b_ih": jax.random.normal(keys[6], (4 * H,), jnp.float32) * s,
        "lstm_b_hh": jax.random.normal(keys[7], (4 * H,), jnp.float32) * s,
        "fc_w":      jax.random.normal(keys[8], (V, 2 * H), jnp.float32) * s,
        "fc_b":      jax.random.normal(keys[9], (V,), jnp.float32) * s,
    }


if __name__ == "__main__":
    B, S, H, V = 2, 8, 32, 16          # batch, src-seq, hidden, output_size
    # (for best TPU efficiency callers should use B a multiple of 8 and
    #  H a multiple of 128; the kernels are correct for any shape.)

    root = jax.random.PRNGKey(0)
    k_tok, k_hid, k_cell, k_enc, k_par = jax.random.split(root, 5)

    token_ids = jax.random.randint(k_tok, (B,), 0, V, dtype=jnp.int32)
    hidden = jax.random.normal(k_hid, (B, H), jnp.float32)
    cell = jax.random.normal(k_cell, (B, H), jnp.float32)
    encoder_outputs = jax.random.normal(k_enc, (B, S, H), jnp.float32)

    raw = init_torch_params(k_par, output_size=V, hidden_size=H)
    params = prepare_params(raw, hidden_size=H)     # one-time weight prep

    pred, h_new, c_new, attn = decoder_forward(
        params, token_ids, hidden, cell, encoder_outputs, output_size=V)
    jax.block_until_ready((pred, h_new, c_new, attn))

    assert pred.shape == (B, V)
    assert h_new.shape == (B, H)
    assert c_new.shape == (B, H)
    assert attn.shape == (B, S)
    print("KERNEL_OK")
</pallas_src>

<mosaic_0001>
module attributes {stable_mosaic.version = 11 : i64} {
  func.func @_vocab_proj_kernel(%arg0: i32, %arg1: memref<2x64xbf16, #tpu.memory_space<vmem>>, %arg2: memref<64x128xbf16, #tpu.memory_space<vmem>>, %arg3: memref<1x128xf32, #tpu.memory_space<vmem>>, %arg4: memref<2x128xf32, #tpu.memory_space<vmem>>) attributes {dimension_semantics = [#tpu.dimension_semantics<parallel>], iteration_bounds = array<i64: 1>, scalar_prefetch = 0 : i64, scratch_operands = 0 : i64, tpu.core_type = #tpu.core_type<tc>, window_params = [{pipeline_mode = #tpu.pipeline_mode<synchronous>, transform_indices = @transform_0, window_bounds = array<i64: 2, 64>}, {transform_indices = @transform_1, window_bounds = array<i64: 64, 128>}, {transform_indices = @transform_2, window_bounds = array<i64: 1, 128>}, {transform_indices = @transform_3, window_bounds = array<i64: 2, 128>}]} {
    %c0 = arith.constant 0 : index
    %c0_0 = arith.constant 0 : index
    %0 = vector.load %arg1[%c0, %c0_0] : memref<2x64xbf16, #tpu.memory_space<vmem>>, vector<2x64xbf16>
    %c0_1 = arith.constant 0 : index
    %c0_2 = arith.constant 0 : index
    %1 = vector.load %arg2[%c0_1, %c0_2] : memref<64x128xbf16, #tpu.memory_space<vmem>>, vector<64x128xbf16>
    %cst = arith.constant dense<0.000000e+00> : vector<2x128xf32>
    %2 = tpu.matmul %0, %1, %cst {dimension_numbers = #tpu.dot_dimension_numbers<[1], [0], [0], [1], [0, 0, 1, 1], [], []>} : vector<2x64xbf16>, vector<64x128xbf16>, vector<2x128xf32> -> vector<2x128xf32>
    %c0_3 = arith.constant 0 : index
    %c0_4 = arith.constant 0 : index
    %3 = vector.load %arg3[%c0_3, %c0_4] : memref<1x128xf32, #tpu.memory_space<vmem>>, vector<1x128xf32>
    %4 = vector.broadcast %3 : vector<1x128xf32> to vector<2x128xf32>
    %5 = arith.addf %2, %4 : vector<2x128xf32>
    %c0_5 = arith.constant 0 : index
    %c0_6 = arith.constant 0 : index
    %6 = vector.load %arg4[%c0_5, %c0_6] : memref<2x128xf32, #tpu.memory_space<vmem>>, vector<2x128xf32>
    tpu.vector_store %arg4[%c0_5, %c0_6], %5 {strides = array<i32>} : memref<2x128xf32, #tpu.memory_space<vmem>>, vector<2x128xf32>,
    return
  }
  func.func @transform_0(%arg0: i32) -> (i32, i32) {
    %c0_i32 = arith.constant 0 : i32
    %c0_i32_0 = arith.constant 0 : i32
    %c0_i32_1 = arith.constant 0 : i32
    return %c0_i32, %c0_i32_0 : i32, i32
  }
  func.func @transform_1(%arg0: i32) -> (i32, i32) {
    %c0_i32 = arith.constant 0 : i32
    %c0_i32_0 = arith.constant 0 : i32
    return %c0_i32, %arg0 : i32, i32
  }
  func.func @transform_2(%arg0: i32) -> (i32, i32) {
    %c0_i32 = arith.constant 0 : i32
    %c0_i32_0 = arith.constant 0 : i32
    return %c0_i32, %arg0 : i32, i32
  }
  func.func @transform_3(%arg0: i32) -> (i32, i32) {
    %c0_i32 = arith.constant 0 : i32
    %c0_i32_0 = arith.constant 0 : i32
    return %c0_i32, %arg0 : i32, i32
  }
}

module attributes {stable_mosaic.version = 11 : i64} {
  func.func @_attn_lstm_kernel(%arg0: memref<2x32xf32, #tpu.memory_space<vmem>>, %arg1: memref<2x32xf32, #tpu.memory_space<vmem>>, %arg2: memref<2x32xf32, #tpu.memory_space<vmem>>, %arg3: memref<2x8x32xf32, #tpu.memory_space<vmem>>, %arg4: memref<32x32xbf16, #tpu.memory_space<vmem>>, %arg5: memref<32x32xbf16, #tpu.memory_space<vmem>>, %arg6: memref<1x1x32xf32, #tpu.memory_space<vmem>>, %arg7: memref<1x1x32xf32, #tpu.memory_space<vmem>>, %arg8: memref<96x128xbf16, #tpu.memory_space<vmem>>, %arg9: memref<1x128xf32, #tpu.memory_space<vmem>>, %arg10: memref<2x32xf32, #tpu.memory_space<vmem>>, %arg11: memref<2x32xf32, #tpu.memory_space<vmem>>, %arg12: memref<2x8xf32, #tpu.memory_space<vmem>>, %arg13: memref<2x64xbf16, #tpu.memory_space<vmem>>) attributes {dimension_semantics = [], scalar_prefetch = 0 : i64, scratch_operands = 0 : i64, tpu.core_type = #tpu.core_type<tc>} {
    %c0 = arith.constant 0 : index
    %c0_0 = arith.constant 0 : index
    %0 = vector.load %arg0[%c0, %c0_0] : memref<2x32xf32, #tpu.memory_space<vmem>>, vector<2x32xf32>
    %c0_1 = arith.constant 0 : index
    %c0_2 = arith.constant 0 : index
    %1 = vector.load %arg1[%c0_1, %c0_2] : memref<2x32xf32, #tpu.memory_space<vmem>>, vector<2x32xf32>
    %c0_3 = arith.constant 0 : index
    %c0_4 = arith.constant 0 : index
    %2 = vector.load %arg2[%c0_3, %c0_4] : memref<2x32xf32, #tpu.memory_space<vmem>>, vector<2x32xf32>
    %c0_5 = arith.constant 0 : index
    %c0_6 = arith.constant 0 : index
    %c0_7 = arith.constant 0 : index
    %3 = vector.load %arg3[%c0_5, %c0_6, %c0_7] : memref<2x8x32xf32, #tpu.memory_space<vmem>>, vector<2x8x32xf32>
    %4 = arith.truncf %1 : vector<2x32xf32> to vector<2x32xbf16>
    %c0_8 = arith.constant 0 : index
    %c0_9 = arith.constant 0 : index
    %5 = vector.load %arg4[%c0_8, %c0_9] : memref<32x32xbf16, #tpu.memory_space<vmem>>, vector<32x32xbf16>
    %cst = arith.constant dense<0.000000e+00> : vector<2x32xf32>
    %6 = tpu.matmul %4, %5, %cst {dimension_numbers = #tpu.dot_dimension_numbers<[1], [0], [0], [1], [0, 0, 1, 1], [], []>} : vector<2x32xbf16>, vector<32x32xbf16>, vector<2x32xf32> -> vector<2x32xf32>
    %7 = arith.truncf %3 : vector<2x8x32xf32> to vector<2x8x32xbf16>
    %c0_10 = arith.constant 0 : index
    %c0_11 = arith.constant 0 : index
    %8 = vector.load %arg5[%c0_10, %c0_11] : memref<32x32xbf16, #tpu.memory_space<vmem>>, vector<32x32xbf16>
    %cst_12 = arith.constant dense<0.000000e+00> : vector<2x8x32xf32>
    %9 = tpu.matmul %7, %8, %cst_12 {dimension_numbers = #tpu.dot_dimension_numbers<[2], [0], [0, 1], [1], [0, 0, 0, 1, 1, 1], [], []>} : vector<2x8x32xbf16>, vector<32x32xbf16>, vector<2x8x32xf32> -> vector<2x8x32xf32>
    %10 = vector.shape_cast %6 : vector<2x32xf32> to vector<2x1x32xf32>
    %11 = vector.broadcast %10 : vector<2x1x32xf32> to vector<2x8x32xf32>
    %12 = arith.addf %9, %11 : vector<2x8x32xf32>
    %c0_13 = arith.constant 0 : index
    %c0_14 = arith.constant 0 : index
    %c0_15 = arith.constant 0 : index
    %13 = vector.load %arg6[%c0_13, %c0_14, %c0_15] : memref<1x1x32xf32, #tpu.memory_space<vmem>>, vector<1x1x32xf32>
    %14 = vector.broadcast %13 : vector<1x1x32xf32> to vector<2x8x32xf32>
    %15 = arith.addf %12, %14 : vector<2x8x32xf32>
    %16 = math.tanh %15 : vector<2x8x32xf32>
    %c0_16 = arith.constant 0 : index
    %c0_17 = arith.constant 0 : index
    %c0_18 = arith.constant 0 : index
    %17 = vector.load %arg7[%c0_16, %c0_17, %c0_18] : memref<1x1x32xf32, #tpu.memory_space<vmem>>, vector<1x1x32xf32>
    %18 = vector.broadcast %17 : vector<1x1x32xf32> to vector<2x8x32xf32>
    %19 = arith.mulf %16, %18 : vector<2x8x32xf32>
    %cst_19 = arith.constant dense<0.000000e+00> : vector<2x8xf32>
    %20 = vector.multi_reduction <add>, %19, %cst_19 [2] : vector<2x8x32xf32> to vector<2x8xf32>
    %cst_20 = arith.constant dense<0xFF800000> : vector<2xf32>
    %21 = vector.multi_reduction <maximumf>, %20, %cst_20 [1] : vector<2x8xf32> to vector<2xf32>
    %22 = vector.shape_cast %21 : vector<2xf32> to vector<2x1xf32>
    %23 = vector.broadcast %22 : vector<2x1xf32> to vector<2x8xf32>
    %24 = arith.subf %20, %23 : vector<2x8xf32>
    %25 = math.exp %24 : vector<2x8xf32>
    %cst_21 = arith.constant dense<0.000000e+00> : vector<2xf32>
    %26 = vector.multi_reduction <add>, %25, %cst_21 [1] : vector<2x8xf32> to vector<2xf32>
    %27 = vector.shape_cast %26 : vector<2xf32> to vector<2x1xf32>
    %28 = tpu.reciprocal %27 {approx = true} : vector<2x1xf32> -> vector<2x1xf32>
    %29 = vector.broadcast %28 : vector<2x1xf32> to vector<2x8xf32>
    %30 = arith.mulf %25, %29 : vector<2x8xf32>
    %c0_22 = arith.constant 0 : index
    %c0_23 = arith.constant 0 : index
    %31 = vector.load %arg12[%c0_22, %c0_23] : memref<2x8xf32, #tpu.memory_space<vmem>>, vector<2x8xf32>
    tpu.vector_store %arg12[%c0_22, %c0_23], %30 {strides = array<i32>} : memref<2x8xf32, #tpu.memory_space<vmem>>, vector<2x8xf32>,
    %32 = vector.shape_cast %30 : vector<2x8xf32> to vector<2x1x8xf32>
    %cst_24 = arith.constant dense<0.000000e+00> : vector<2x1x32xf32>
    %33 = tpu.matmul %32, %3, %cst_24 {dimension_numbers = #tpu.dot_dimension_numbers<[2], [1], [1], [2], [0, 0, 0, 1, 1, 2], [0], [0]>} : vector<2x1x8xf32>, vector<2x8x32xf32>, vector<2x1x32xf32> -> vector<2x1x32xf32>
    %34 = vector.shape_cast %33 : vector<2x1x32xf32> to vector<2x32xf32>
    %35 = tpu.concatenate %0, %34, %1 in 1 : vector<2x32xf32>, vector<2x32xf32>, vector<2x32xf32> -> vector<2x96xf32>
    %36 = arith.truncf %35 : vector<2x96xf32> to vector<2x96xbf16>
    %c0_25 = arith.constant 0 : index
    %c0_26 = arith.constant 0 : index
    %37 = vector.load %arg8[%c0_25, %c0_26] : memref<96x128xbf16, #tpu.memory_space<vmem>>, vector<96x128xbf16>
    %cst_27 = arith.constant dense<0.000000e+00> : vector<2x128xf32>
    %38 = tpu.matmul %36, %37, %cst_27 {dimension_numbers = #tpu.dot_dimension_numbers<[1], [0], [0], [1], [0, 0, 1, 1], [], []>} : vector<2x96xbf16>, vector<96x128xbf16>, vector<2x128xf32> -> vector<2x128xf32>
    %c0_28 = arith.constant 0 : index
    %c0_29 = arith.constant 0 : index
    %39 = vector.load %arg9[%c0_28, %c0_29] : memref<1x128xf32, #tpu.memory_space<vmem>>, vector<1x128xf32>
    %40 = vector.broadcast %39 : vector<1x128xf32> to vector<2x128xf32>
    %41 = arith.addf %38, %40 : vector<2x128xf32>
    %42 = vector.extract_strided_slice %41 {offsets = [0, 0], sizes = [2, 32], strides = [1, 1]} : vector<2x128xf32> to vector<2x32xf32>
    %43 = arith.negf %42 : vector<2x32xf32>
    %44 = math.exp %43 : vector<2x32xf32>
    %cst_30 = arith.constant 1.000000e+00 : f32
    %45 = vector.broadcast %cst_30 : f32 to vector<2x32xf32>
    %46 = arith.addf %45, %44 : vector<2x32xf32>
    %47 = arith.divf %45, %46 : vector<2x32xf32>
    %48 = vector.extract_strided_slice %41 {offsets = [0, 32], sizes = [2, 32], strides = [1, 1]} : vector<2x128xf32> to vector<2x32xf32>
    %49 = arith.negf %48 : vector<2x32xf32>
    %50 = math.exp %49 : vector<2x32xf32>
    %cst_31 = arith.constant 1.000000e+00 : f32
    %51 = vector.broadcast %cst_31 : f32 to vector<2x32xf32>
    %52 = arith.addf %51, %50 : vector<2x32xf32>
    %53 = arith.divf %51, %52 : vector<2x32xf32>
    %54 = vector.extract_strided_slice %41 {offsets = [0, 64], sizes = [2, 32], strides = [1, 1]} : vector<2x128xf32> to vector<2x32xf32>
    %55 = math.tanh %54 : vector<2x32xf32>
    %56 = vector.extract_strided_slice %41 {offsets = [0, 96], sizes = [2, 32], strides = [1, 1]} : vector<2x128xf32> to vector<2x32xf32>
    %57 = arith.negf %56 : vector<2x32xf32>
    %58 = math.exp %57 : vector<2x32xf32>
    %cst_32 = arith.constant 1.000000e+00 : f32
    %59 = vector.broadcast %cst_32 : f32 to vector<2x32xf32>
    %60 = arith.addf %59, %58 : vector<2x32xf32>
    %61 = arith.divf %59, %60 : vector<2x32xf32>
    %62 = arith.mulf %53, %2 : vector<2x32xf32>
    %63 = arith.mulf %47, %55 : vector<2x32xf32>
    %64 = arith.addf %62, %63 : vector<2x32xf32>
    %65 = math.tanh %64 : vector<2x32xf32>
    %66 = arith.mulf %61, %65 : vector<2x32xf32>
    %c0_33 = arith.constant 0 : index
    %c0_34 = arith.constant 0 : index
    %67 = vector.load %arg11[%c0_33, %c0_34] : memref<2x32xf32, #tpu.memory_space<vmem>>, vector<2x32xf32>
    tpu.vector_store %arg11[%c0_33, %c0_34], %64 {strides = array<i32>} : memref<2x32xf32, #tpu.memory_space<vmem>>, vector<2x32xf32>,
    %c0_35 = arith.constant 0 : index
    %c0_36 = arith.constant 0 : index
    %68 = vector.load %arg10[%c0_35, %c0_36] : memref<2x32xf32, #tpu.memory_space<vmem>>, vector<2x32xf32>
    tpu.vector_store %arg10[%c0_35, %c0_36], %66 {strides = array<i32>} : memref<2x32xf32, #tpu.memory_space<vmem>>, vector<2x32xf32>,
    %69 = tpu.concatenate %66, %34 in 1 : vector<2x32xf32>, vector<2x32xf32> -> vector<2x64xf32>
    %70 = arith.truncf %69 : vector<2x64xf32> to vector<2x64xbf16>
    %c0_37 = arith.constant 0 : index
    %c0_38 = arith.constant 0 : index
    %71 = vector.load %arg13[%c0_37, %c0_38] : memref<2x64xbf16, #tpu.memory_space<vmem>>, vector<2x64xbf16>
    tpu.vector_store %arg13[%c0_37, %c0_38], %70 {strides = array<i32>} : memref<2x64xbf16, #tpu.memory_space<vmem>>, vector<2x64xbf16>,
    return
  }
}

</mosaic_0001>

<bundles_post_ra>
// kernel: decoder_forward.3
= control target key start
LH: loop header
LB: loop body
LE: loop exit
PB: predicated region body
PF: predicated region fallthrough
CT: control target
= control target key end

     0   :  { %s178_s0 = inlined_call_operand.vmem [shape: bf16[2,64], index: 0, kind: input, shape index: {}]   ;;  %s179_s1 = inlined_call_operand.vmem [shape: bf16[64,128], index: 1, kind: input, shape index: {}]   ;;  %s180_s2 = inlined_call_operand.vmem [shape: f32[1,128], index: 2, kind: input, shape index: {}]   ;;  %s181_s3 = inlined_call_operand.hbm [shape: f32[2,128], index: 3, kind: output, shape index: {}]  }
   0x1   :  { %v107_v0 = vld [vmem:[%s179_s1 + $0x18] sm:$0xff]  ;;  %v106_v1 = vld [vmem:[%s179_s1 + $0x10] sm:$0xff] }
   0x2   :  { %61 = vmatpush.bf16.msra.mxu0 %v107_v0 }
   0x3   :  { %8 = vsyncpa [#allocation3], 0  ;;  %v105_v2 = vld [vmem:[%s179_s1 + $0x8] sm:$0xff]  ;;  %v104_v3 = vld [vmem:[%s179_s1] sm:$0xff]  ;;  %vm53_vm0 = vcmask 523264   ;;  %s136_s24 = smov [#allocation2]  }
   0x4   :  { %v16_v4 = vld [vmem:[%s178_s0] sm:$0x1]  ;;  %s76_s25 = sshll.u32 %s136_s24, 4  ;;  %s78_s28 = sshll.u32 %s181_s3, 4  ;;  %s77_s25 = int_to_ptr.vmem [resolvable:$true] %s76_s25  ;;  %s79_s28 = int_to_ptr.hbm [resolvable:$true] %s78_s28 }
   0x5   :  { %v109_v5 = vld [vmem:[%s180_s2] ss:$0 sm:$0xff] }
   0x6   :  { %62 = vmatpush.bf16.msra.mxu0 %v106_v1 }
   0xa   :  { %63 = vmatpush.bf16.msra.mxu0 %v105_v2 }
   0xe   :  { %64 = vmatpush.bf16.msra.mxu0 %v104_v3 }
  0x11   :  { %103 = vmatmul.msk.bf16.vlgmr.msra.gmra.mxu0 %vm53_vm0, %v16_v4 }
  0x8e   :  { %v66_v6 = vpop.f32.mrf.mxu0 }
  0x8f   :  { %v67_v7 = vadd.f32 %v109_v5, %v66_v6 }
  0x91   :  { %70 = vst [vmem:[#allocation2] sm:$0x3] %v67_v7 }
  0x92   :  { %81 = dma.vmem_to_hbm [thread:$0]  %s77_s25, 32, %s79_s28, [#allocation3]  }
  0x96   :  { %v68_v8 = vpop.f32.mrf.mxu0 }
  0x97   :  { %134 = dma.done.wait [#allocation3], 32  }
  0x98   :  { %135 = vsyncadd [#allocation3], 4294967264 }
  0x99   :  { %86 = vsyncpa [#allocation3], 1 }

// kernel: decoder_forward.2
= control target key start
LH: loop header
LB: loop body
LE: loop exit
PB: predicated region body
PF: predicated region fallthrough
CT: control target
= control target key end

     0   :  { %19 = vsyncpa [#allocation3], 0  ;;  %s864_s0 = inlined_call_operand.vmem [shape: f32[2,32], index: 0, kind: input, shape index: {}]   ;;  %s865_s1 = inlined_call_operand.vmem [shape: f32[2,32], index: 1, kind: input, shape index: {}, may-alias: {1,10}]   ;;  %s866_s2 = inlined_call_operand.vmem [shape: f32[2,32], index: 2, kind: input, shape index: {}, may-alias: {2,11}]   ;;  %s867_s3 = inlined_call_operand.hbm [shape: f32[2,8,32], index: 3, kind: input, shape index: {}]   ;;  %s868_s4 = inlined_call_operand.hbm [shape: bf16[32,32], index: 4, kind: input, shape index: {}]   ;;  %s869_s5 = inlined_call_operand.hbm [shape: bf16[32,32], index: 5, kind: input, shape index: {}]   ;;  %s870_s6 = inlined_call_operand.vmem [shape: f32[1,1,32], index: 6, kind: input, shape index: {}]   ;;  %s871_s7 = inlined_call_operand.vmem [shape: f32[1,1,32], index: 7, kind: input, shape index: {}]   ;;  %s872_s8 = inlined_call_operand.hbm [shape: bf16[96,128], index: 8, kind: input, shape index: {}]   ;;  %s873_s9 = inlined_call_operand.vmem [shape: f32[1,128], index: 9, kind: input, shape index: {}]   ;;  %s874_s10 = inlined_call_operand.vmem [shape: f32[2,32], index: 10, kind: output, shape index: {0}, may-alias: {1,10}]   ;;  %s875_s11 = inlined_call_operand.vmem [shape: f32[2,32], index: 11, kind: output, shape index: {1}, may-alias: {2,11}]   ;;  %s876_s12 = inlined_call_operand.hbm [shape: f32[2,8], index: 12, kind: output, shape index: {2}]   ;;  %s877_s13 = inlined_call_operand.vmem [shape: bf16[2,64], index: 13, kind: output, shape index: {3}]  }
   0x1   :  { %20 = vsyncpa [#allocation6], 0 }
   0x2   :  { %21 = vsyncpa [#allocation9], 0  ;;  %s46_s27 = sshll.u32 %s868_s4, 4  ;;  %s47_s27 = int_to_ptr.hbm [resolvable:$true] %s46_s27 }
   0x3   :  { %22 = vsyncpa [#allocation4], 0  ;;  %s705_s28 = smov [#allocation5]   ;;  %s33_s15 = sshll.u32 %s867_s3, 4  ;;  %s34_s15 = int_to_ptr.hbm [resolvable:$true] %s33_s15 }
   0x4   :  { %s48_s29 = sshll.u32 %s705_s28, 4  ;;  %s706_s16 = smov 64   ;;  %s49_s29 = int_to_ptr.vmem [resolvable:$true] %s48_s29 }
   0x5   :  { %s707_s17 = smov 4   ;;  %s708_s18 = smov [#allocation2]  }
   0x6   :  { %54 = dma.hbm_to_vmem [thread:$0]  %s47_s27, 256, %s49_s29, [#allocation6], %s706_s16, %s706_s16, %s707_s17  }
   0x7   :  { %s35_s19 = sshll.u32 %s708_s18, 4  ;;  %s709_s20 = smov 128   ;;  %s36_s19 = int_to_ptr.vmem [resolvable:$true] %s35_s19 }
   0x8   :  { %s710_s4 = smov 8   ;;  %s59_s23 = sshll.u32 %s869_s5, 4  ;;  %s60_s23 = int_to_ptr.hbm [resolvable:$true] %s59_s23 }
   0x9   :  { %41 = dma.hbm_to_vmem [thread:$0]  %s34_s15, 256, %s36_s19, [#allocation3], %s709_s20, %s709_s20, %s710_s4  }
   0xa   :  { %s711_s24 = smov [#allocation7]   ;;  %s76_s28 = sshll.u32 %s872_s8, 4  ;;  %s77_s28 = int_to_ptr.hbm [resolvable:$true] %s76_s28 }
   0xb   :  { %s61_s25 = sshll.u32 %s711_s24, 4  ;;  %s712_s27 = smov [#allocation8]   ;;  %s62_s25 = int_to_ptr.vmem [resolvable:$true] %s61_s25 }
   0xc   :  { %67 = dma.hbm_to_vmem [thread:$0]  %s60_s23, 256, %s62_s25, [#allocation6], %s706_s16, %s706_s16, %s707_s17  }
   0xd   :  { %s78_s29 = sshll.u32 %s712_s27, 4  ;;  %s79_s29 = int_to_ptr.vmem [resolvable:$true] %s78_s29 }
   0xe   :  { %84 = dma.hbm_to_vmem [thread:$0]  %s77_s28, 768, %s79_s29, [#allocation9], %s706_s16, %s706_s16, %s707_s17  }
   0xf   :  { %697 = dma.done.wait [#allocation3], 256  }
  0x10   :  { %698 = vsyncadd [#allocation3], 4294967040 }
  0x11   :  { %699 = dma.done.wait [#allocation6], 512  }
  0x12   :  { %700 = vsyncadd [#allocation6], 4294966784 }
  0x13   :  { %701 = dma.done.wait [#allocation9], 768  }
  0x14   :  { %702 = vsyncadd [#allocation9], 4294966528  ;;  %v532_v0 = vld [vmem:[#allocation5 + $0x8] sm:$0xff]  ;;  %v534_v1 = vld [vmem:[#allocation7 + $0x8] sm:$0xff]  ;;  %vm126_vm0 = vcmask 261120   ;;  %v211_v33 = vlaneseq  ;;  %vm215_vm1 = vcmask 1041409  }
  0x15   :  { %v531_v2 = vld [vmem:[#allocation5] sm:$0xff]  ;;  %v533_v3 = vld [vmem:[#allocation7] sm:$0xff]  ;;  %136 = vmatpush.bf16.msra.mxu0 %v532_v0  ;;  %181 = vmatpush.bf16.msra.mxu1 %v534_v1  ;;  %v108_v6 = vld [vmem:[#allocation2 + $0x8] sm:$0xff]  ;;  %vm218_vm2 = vcmask 58368   ;;  %v713_v40 = vmov 0   ;;  %vm269_vm3 = vcmask 64512  }
  0x16   :  { %v808_v4 = vld [vmem:[%s865_s1] sm:$0x3]  ;;  %v144_v8 = vpack.c.bf16 %v108_v6, %v108_v6  ;;  %v212_v34 = vand.u32 127, %v211_v33  ;;  %554 = vset.pattern.permute.xlu2 %v713_v40  ;;  %553 = vset.pattern.permute.xlu1 %v713_v40  ;;  %vm326_vm4 = vcmask 523264   ;;  %vm381_vm5 = vcmask 785408   ;;  %s465_s23 = sshll.u32 %s876_s12, 4  ;;  %s466_s23 = int_to_ptr.hbm [resolvable:$true] %s465_s23 }
  0x17   :  { %v107_v5 = vld [vmem:[#allocation2] sm:$0xff]  ;;  %v109_v10 = vpack.c.bf16 %v808_v4, %v808_v4  ;;  %555 = vset.pattern.permute.xlu0 %v713_v40  ;;  %vm443_vm10 = vcmask 254976   ;;  %vm452_vm11 = vcmask 516096  }
  0x18   :  { %v143_v7 = vpack.c.bf16 %v107_v5, %v107_v5  ;;  %287 = vmatpush.msra.mxu3 %v107_v5  ;;  %v158_v11 = vunpack.c.l.b16 %v144_v8  ;;  %v556_v16 = vld [vmem:[%s870_s6] ss:$0 sm:$0xff]  ;;  %v539_v5 = vld [vmem:[#allocation8 + $0x20] sm:$0xff]  ;;  %s714_s6 = smov 32  }
  0x19   :  { %137 = vmatpush.bf16.msra.mxu0 %v531_v2  ;;  %182 = vmatpush.bf16.msra.mxu1 %v533_v3  ;;  %v557_v24 = vld [vmem:[%s871_s7] ss:$0 sm:$0xff]  ;;  %v540_v3 = vld [vmem:[#allocation8 + $0x28] sm:$0xff] }
  0x1a   :  { %v157_v9 = vunpack.c.l.b16 %v143_v7  ;;  %309 = vmatpush.msrb.mxu3 %v108_v6  ;;  %387 = vmatpush.bf16.msra.mxu2 %v540_v3  ;;  %v538_v6 = vld [vmem:[#allocation8 + $0x18] sm:$0xff] }
  0x1c   :  { %v159_v12 = vpack.c.b16 %v158_v11, %v157_v9  ;;  %493 = vmatmul.msk.bf16.vlgmr.msra.gmra.mxu0 %vm126_vm0, %v109_v10  ;;  %v537_v11 = vld [vmem:[#allocation8 + $0x10] sm:$0xff] }
  0x1e   :  { %502 = vmatmul.msk.bf16.vlgmr.msra.gmra.mxu1 %vm126_vm0, %v159_v12  ;;  %388 = vmatpush.bf16.msra.mxu2 %v539_v5  ;;  %v536_v12 = vld [vmem:[#allocation8 + $0x8] sm:$0xff] }
  0x22   :  { %389 = vmatpush.bf16.msra.mxu2 %v538_v6 }
  0x26   :  { %390 = vmatpush.bf16.msra.mxu2 %v537_v11 }
  0x2a   :  { %391 = vmatpush.bf16.msra.mxu2 %v536_v12 }
  0x99   :  { %v139_v13 = vpop.f32.mrf.mxu0 }
  0x9a   :  { %v151_v15 = vperm.slane %v139_v13, 0  ;;  %v150_v17 = vrot.slane %v139_v13, 1  ;;  %v535_v13 = vld [vmem:[#allocation8] sm:$0xff] }
  0x9b   :  { %v184_v14 = vpop.f32.mrf.mxu1  ;;  %392 = vmatpush.bf16.msra.mxu2 %v535_v13 }
  0x9c   :  { %v185_v18 = vadd.f32 %v184_v14, %v151_v15  ;;  %v152_v20 = vperm.slane %v150_v17, 0  ;;  %v106_v14 = vld [vmem:[%s866_s2] sm:$0x3]  ;;  %s716_s2 = smov [#allocation10]  }
  0x9e   :  { %v193_v19 = vadd.f32 %v556_v16, %v185_v18 }
  0xa0   :  { %559 = vtanh.f32 %v193_v19 }
  0xa1   :  { %v141_v21 = vpop.f32.mrf.mxu0 }
  0xa3   :  { %v186_v22 = vpop.f32.mrf.mxu1 }
  0xa4   :  { %v187_v23 = vadd.f32 %v186_v22, %v152_v20  ;;  %v558_v20 = vld [vmem:[%s873_s9] ss:$0 sm:$0xff]  ;;  %s463_s9 = sshll.u32 %s716_s2, 4  ;;  %s464_s9 = int_to_ptr.vmem [resolvable:$true] %s463_s9 }
  0xa6   :  { %v194_v25 = vadd.f32 %v556_v16, %v187_v23  ;;  %v560_v26 = vpop.eup %559  ;;  %v104_v16 = vld [vmem:[%s864_s0] sm:$0x3]  ;;  %s715_s0 = smov 96  }
  0xa7   :  { %v201_v27 = vmul.f32 %v560_v26, %v557_v24 }
  0xa8   :  { %561 = vtanh.f32 %v194_v25 }
  0xa9   :  { %v203_v28 = vsel %vm126_vm0, %v201_v27, 0.0 }
  0xaa   :  { %204 = vadd.xlane.f32.xlu0 %v203_v28 }
  0xae   :  { %v562_v29 = vpop.eup %561 }
  0xaf   :  { %v202_v30 = vmul.f32 %v562_v29, %v557_v24 }
  0xb1   :  { %v206_v31 = vsel %vm126_vm0, %v202_v30, 0.0 }
  0xb2   :  { %207 = vadd.xlane.f32.xlu0 %v206_v31 }
 0x11d   :  { %v205_v32 = vpop.xlane.xlu0 %204 }
 0x11e   :  { %v213_v36 = vperm.slane %v205_v32, %v212_v34 }
 0x125   :  { %v208_v35 = vpop.xlane.xlu0 %207 }
 0x126   :  { %v214_v37 = vperm.slane %v208_v35, %v212_v34 }
 0x128   :  { %v216_v38 = vsel %vm215_vm1, %v214_v37, %v213_v36 }
 0x129   :  { %v219_v39 = vsel %vm218_vm2, %v216_v38, -inf }
 0x12a   :  { %220 = vmax.xlane.f32.xlu1 %v219_v39 }
 0x19d   :  { %v221_v41 = vpop.xlane.xlu1 %220 }
 0x19e   :  { %v223_v42 = vperm.slane %v221_v41, 0  ;;  %v224_v43 = vperm.slane %v221_v41, 1 }
 0x1a0   :  { %v227_v44 = vsub.f32 %v205_v32, %v223_v42  ;;  %v228_v45 = vsub.f32 %v208_v35, %v224_v43 }
 0x1a2   :  { %v229_v46 = vmul.f32 1.442695, %v227_v44  ;;  %v231_v47 = vmul.f32 1.442695, %v228_v45 }
 0x1a4   :  { %563 = vpow2.f32 %v229_v46 }
 0x1a5   :  { %565 = vpow2.f32 %v231_v47 }
 0x1aa   :  { %v564_v48 = vpop.eup %563 }
 0x1ab   :  { %v566_v49 = vpop.eup %565  ;;  %236 = vperm.xlu1 %553, %v564_v48  }
 0x1ac   :  { %239 = vperm.xlu2 %554, %v566_v49  }
 0x206   :  { %v240_v50 = vpop.permute.xlu2 %239 }
 0x207   :  { %v242_v52 = vperm.slane %v240_v50, %v212_v34 }
 0x21d   :  { %v237_v51 = vpop.permute.xlu1 %236 }
 0x21e   :  { %v241_v53 = vperm.slane %v237_v51, %v212_v34 }
 0x220   :  { %v243_v54 = vsel %vm215_vm1, %v242_v52, %v241_v53 }
 0x221   :  { %v245_v55 = vsel %vm218_vm2, %v243_v54, 0.0 }
 0x222   :  { %246 = vadd.xlane.f32.xlu2 %v245_v55 }
 0x295   :  { %v247_v56 = vpop.xlane.xlu2 %246 }
 0x296   :  { %567 = vrcp.f32 %v247_v56 }
 0x29c   :  { %v568_v57 = vpop.eup %567 }
 0x29d   :  { %v251_v58 = vperm.slane %v568_v57, 1  ;;  %v250_v59 = vperm.slane %v568_v57, 0 }
 0x29f   :  { %v255_v60 = vmul.f32 %v566_v49, %v251_v58  ;;  %v254_v61 = vmul.f32 %v564_v48, %v250_v59 }
 0x2a1   :  { %262 = vperm.xlu1 %553, %v255_v60   ;;  %259 = vperm.xlu0 %555, %v254_v61  }
 0x2a9   :  { %419 = vrot.lane.b32.xlu0 %v106_v14, %s714_s6 }
 0x313   :  { %v263_v62 = vpop.permute.xlu1 %262  ;;  %v260_v63 = vpop.permute.xlu0 %259 }
 0x314   :  { %v265_v0 = vperm.slane %v263_v62, %v212_v34  ;;  %v264_v1 = vperm.slane %v260_v63, %v212_v34 }
 0x316   :  { %v266_v2 = vsel %vm215_vm1, %v265_v0, %v264_v1  ;;  %503 = vmatmul.msk.f32.vlgmr.msra.gmra.mxu3 %vm269_vm3, %v264_v1 }
 0x317   :  { %268 = vst.msk [vmem:[#allocation10] sm:$0x3] %vm218_vm2, %v266_v2 }
 0x318   :  { %468 = dma.vmem_to_hbm [thread:$0]  %s464_s9, 32, %s466_s23, [#allocation4]  }
 0x31b   :  { %v420_v40 = vpop.permute.xlu0 %419 }
 0x31e   :  { %504 = vmatmul.msk.f32.vlgmr.msrb.gmra.mxu3 %vm269_vm3, %v265_v0 }
 0x399   :  { %v289_v7 = vpop.f32.mrf.mxu3 }
 0x3a1   :  { %v311_v8 = vpop.f32.mrf.mxu3 }
 0x3a2   :  { %v316_v9 = vrot.slane %v311_v8, 7 }
 0x3a4   :  { %v317_v10 = vsel %vm215_vm1, %v316_v9, %v289_v7 }
 0x3a5   :  { %318 = vrot.lane.b32.xlu1 %v317_v10, %s714_s6 }
 0x3ad   :  { %322 = vrot.lane.b32.xlu1 %v808_v4, %s706_s16 }
 0x417   :  { %v836_v15 = vpop.permute.xlu1 %318 }
 0x418   :  { %v325_v4 = vsel %vm126_vm0, %v104_v16, %v836_v15 }
 0x41f   :  { %v323_v17 = vpop.permute.xlu1 %322 }
 0x420   :  { %v327_v18 = vsel %vm326_vm4, %v325_v4, %v323_v17 }
 0x421   :  { %v328_v19 = vpack.c.bf16 %v327_v18, %v327_v18 }
 0x423   :  { %529 = vmatmul.msk.bf16.vlgmr.msra.gmra.mxu2 %vm381_vm5, %v328_v19 }
 0x4a6   :  { %v394_v21 = vpop.f32.mrf.mxu2 }
 0x4a7   :  { %v395_v22 = vadd.f32 %v558_v20, %v394_v21 }
 0x4a9   :  { %569 = vtanh.f32 %v395_v22  ;;  %v530_v25 = vmul.f32 -1.442695, %v395_v22 }
 0x4ab   :  { %571 = vpow2.f32 %v530_v25 }
 0x4ae   :  { %v396_v23 = vpop.f32.mrf.mxu2 }
 0x4af   :  { %v570_v24 = vpop.eup %569 }
 0x4b0   :  { %424 = vrot.lane.b32.xlu2 %v570_v24, %s706_s16 }
 0x4b1   :  { %v572_v26 = vpop.eup %571 }
 0x4b2   :  { %v401_v27 = vadd.f32 1.0, %v572_v26 }
 0x4b4   :  { %573 = vrcp.f32 %v401_v27  ;;  %v413_v33 = vand.u32 2147483648, %v401_v27  ;;  %vm407_vm7 = vweird.f32 %v401_v27  ;;  %v411_v34 = vand.u32 2147483647, %v401_v27 }
 0x4b6   :  { %v414_v36 = vor.u32 1.1754944e-38, %v413_v33  ;;  %vm412_vm9 = vcmp.eq.f32.partialorder %v411_v34, 8.507059e+37 }
 0x4ba   :  { %v574_v28 = vpop.eup %573 }
 0x4bb   :  { %v403_v29 = vmul.f32 %v574_v28, %v401_v27  ;;  %vm408_vm6 = vweird.f32 %v574_v28 }
 0x4bc   :  { %vm409_vm8 = vmor %vm407_vm7, %vm408_vm6 }
 0x4bd   :  { %v404_v30 = vsub.f32 1.0, %v403_v29 }
 0x4bf   :  { %v405_v31 = vmul.f32 %v574_v28, %v404_v30 }
 0x4c1   :  { %v406_v32 = vadd.f32 %v574_v28, %v405_v31 }
 0x4c3   :  { %v410_v35 = vsel %vm409_vm8, %v574_v28, %v406_v32 }
 0x4c4   :  { %v415_v37 = vsel %vm412_vm9, %v414_v36, %v410_v35 }
 0x4c5   :  { %v422_v41 = vmul.f32 %v420_v40, %v415_v37 }
 0x50a   :  { %v425_v38 = vpop.permute.xlu2 %424 }
 0x50b   :  { %v427_v39 = vmul.f32 %v425_v38, %v415_v37 }
 0x50d   :  { %429 = vrot.lane.b32.xlu1 %v427_v39, %s714_s6 }
 0x57f   :  { %v430_v42 = vpop.permute.xlu1 %429 }
 0x580   :  { %v432_v43 = vadd.f32 %v430_v42, %v422_v41 }
 0x582   :  { %575 = vtanh.f32 %v432_v43 }
 0x588   :  { %v576_v44 = vpop.eup %575 }
 0x589   :  { %435 = vrot.lane.b32.xlu0 %v576_v44, %s706_s16 }
 0x591   :  { %440 = vrot.lane.b32.xlu0 %v432_v43, %s715_s0 }
 0x5fb   :  { %v436_v45 = vpop.permute.xlu0 %435 }
 0x5fc   :  { %v438_v46 = vmul.f32 %v436_v45, %v415_v37 }
 0x5fe   :  { %446 = vrot.lane.b32.xlu1 %v438_v46, %s714_s6 }
 0x603   :  { %v441_v47 = vpop.permute.xlu0 %440 }
 0x604   :  { %444 = vst.msk [vmem:[%s875_s11] sm:$0x3] %vm443_vm10, %v441_v47 }
 0x670   :  { %v447_v48 = vpop.permute.xlu1 %446 }
 0x671   :  { %449 = vst.msk [vmem:[%s874_s10] sm:$0x3] %vm443_vm10, %v447_v48  ;;  %v450_v49 = vsel %vm126_vm0, %v447_v48, %v836_v15 }
 0x672   :  { %v451_v50 = vpack.c.bf16 %v450_v49, %v450_v49 }
 0x674   :  { %453 = vst.msk [vmem:[%s877_s13] sm:$0x1] %vm452_vm11, %v451_v50 }
 0x675   :  { %703 = dma.done.wait [#allocation4], 32  }
 0x676   :  { %704 = vsyncadd [#allocation4], 4294967264 }
 0x677   :  { %481 = vsyncpa [#allocation3], 1 }
 0x678   :  { %482 = vsyncpa [#allocation6], 1 }
 0x679   :  { %483 = vsyncpa [#allocation9], 1 }
 0x67a   :  { %484 = vsyncpa [#allocation4], 1 }

</bundles_post_ra>
